<compile_context>
chip_gen: v6e
topology: v6e:2x2x1
jax: 0.10.0
libtpu: 0.0.40
codegen_flags: <defaults>
</compile_context>

<pallas_src>
import jax
import jax.numpy as jnp
from jax.experimental import pallas as pl
from jax.experimental.pallas import tpu as pltpu


def _pref_kernel(prod_ref, w1_ref, b1_ref, w2_ref, b2_ref, w3_ref, b3_ref,
                 out_ref):
    # prod_ref: (D, tile_n)  -- products along lanes (lane-dense).
    x = prod_ref[...]

    # Layer 1 (user half already folded into b1'): (H,D)@(D,tn) + (H,1)
    h1 = jnp.dot(w1_ref[...], x, preferred_element_type=jnp.float32) + b1_ref[...]
    h1 = jnp.maximum(h1, 0.0)

    # Dropout(0.2): identity in eval mode (no-op).

    # Layer 2: (H,H)@(H,tn) + (H,1)
    h2 = jnp.dot(w2_ref[...], h1, preferred_element_type=jnp.float32) + b2_ref[...]
    h2 = jnp.maximum(h2, 0.0)

    # Layer 3: (1,H)@(H,tn) + b3  -> (1, tn), already lane-dense.
    logits = jnp.dot(w3_ref[...], h2, preferred_element_type=jnp.float32) + b3_ref[0]

    # Sigmoid: exp on EUP, approx reciprocal also on EUP (otherwise-idle slot).
    scores = pl.reciprocal(1.0 + jnp.exp(-logits), approx=True)   # (1, tile_n)
    out_ref[0] = scores


def user_preference_forward(user_embedding, product_embeddings, params,
                            *, tile_n=512):
    """user_embedding: (D,), product_embeddings: (N, D) -> (N,) preferences."""
    assert tile_n % 128 == 0, "tile_n must be a multiple of 128 (lane width)"
    w1, b1, w2, b2, w3, b3 = params
    n, d = product_embeddings.shape
    h = w1.shape[1]

    f32 = jnp.float32
    user = user_embedding.astype(f32)
    prod = product_embeddings.astype(f32)
    w1 = w1.astype(f32); b1 = b1.astype(f32)
    w2 = w2.astype(f32); b2 = b2.astype(f32)
    w3 = w3.astype(f32); b3 = b3.astype(f32)

    # Fold the (identical-for-every-row) user contribution into the bias.
    b1_fold = (user @ w1[:d]).reshape(1, h) + b1.reshape(1, h)    # (1, H)

    # Transposed (lane-dense) operands: features on sublanes, products on lanes.
    w1t = w1[d:].T                    # (H, D)   product half of W1
    b1t = b1_fold.T                   # (H, 1)
    w2t = w2.T                        # (H, H)
    b2t = b2.reshape(1, h).T          # (H, 1)
    w3t = w3.reshape(h, 1).T          # (1, H)
    b3s = b3.reshape(1)               # (1,)  scalar -> SMEM

    num_tiles = pl.cdiv(n, tile_n)
    n_pad = num_tiles * tile_n
    if n_pad != n:
        prod = jnp.pad(prod, ((0, n_pad - n), (0, 0)))
    prod_t = prod.T                   # (D, n_pad)

    out = pl.pallas_call(
        _pref_kernel,
        out_shape=jax.ShapeDtypeStruct((num_tiles, 1, tile_n), jnp.float32),
        grid_spec=pltpu.PrefetchScalarGridSpec(
            num_scalar_prefetch=0,
            grid=(num_tiles,),
            in_specs=[
                pl.BlockSpec((d, tile_n), lambda i: (0, i)),   # product tile
                pl.BlockSpec((h, d), lambda i: (0, 0)),        # W1[D:]^T
                pl.BlockSpec((h, 1), lambda i: (0, 0)),        # folded b1
                pl.BlockSpec((h, h), lambda i: (0, 0)),        # W2^T
                pl.BlockSpec((h, 1), lambda i: (0, 0)),        # b2
                pl.BlockSpec((1, h), lambda i: (0, 0)),        # W3^T
                pl.BlockSpec(memory_space=pltpu.MemorySpace.SMEM),  # b3 scalar
            ],
            out_specs=pl.BlockSpec((1, 1, tile_n), lambda i: (i, 0, 0)),
        ),
        compiler_params=pltpu.CompilerParams(
            dimension_semantics=("parallel",)),
    )(prod_t, w1t, b1t, w2t, b2t, w3t, b3s)

    # (num_tiles, 1, tile_n) -> (n_pad,) -> drop padded tail -> (n,)
    return out.reshape(n_pad)[:n]


def init_params(key, input_dim=32, hidden_dim=64):
    """Deterministic PyTorch-style (uniform +-1/sqrt(fan_in)) init."""
    ks = jax.random.split(key, 6)

    def lin(kw, kb, fan_in, fan_out):
        bound = 1.0 / jnp.sqrt(fan_in)
        w = jax.random.uniform(kw, (fan_in, fan_out), jnp.float32, -bound, bound)
        b = jax.random.uniform(kb, (1, fan_out), jnp.float32, -bound, bound)
        return w, b

    w1, b1 = lin(ks[0], ks[1], 2 * input_dim, hidden_dim)
    w2, b2 = lin(ks[2], ks[3], hidden_dim, hidden_dim)
    w3, b3 = lin(ks[4], ks[5], hidden_dim, 1)
    return (w1, b1, w2, b2, w3, b3)


def _reference(user_embedding, product_embeddings, params):
    w1, b1, w2, b2, w3, b3 = params
    n = product_embeddings.shape[0]
    user_exp = jnp.broadcast_to(user_embedding[None, :],
                                (n, user_embedding.shape[0]))
    combined = jnp.concatenate([user_exp, product_embeddings], axis=1)
    h1 = jnp.maximum(combined @ w1 + b1, 0.0)
    h2 = jnp.maximum(h1 @ w2 + b2, 0.0)
    return jax.nn.sigmoid(h2 @ w3 + b3).reshape(n)


if __name__ == "__main__":
    input_dim = 32
    hidden_dim = 64
    num_products = 1000   # not a multiple of tile_n -> exercises padding path

    key = jax.random.PRNGKey(0)
    k_user, k_prod, k_params = jax.random.split(key, 3)

    user_embedding = jax.random.normal(k_user, (input_dim,), jnp.float32)
    product_embeddings = jax.random.normal(
        k_prod, (num_products, input_dim), jnp.float32)
    params = init_params(k_params, input_dim, hidden_dim)

    prefs = user_preference_forward(user_embedding, product_embeddings, params)
    prefs = jax.block_until_ready(prefs)

    ref = _reference(user_embedding, product_embeddings, params)
    assert prefs.shape == (num_products,)
    # Tolerance relaxed (vs 1e-5) because the sigmoid uses the EUP approximate
    # reciprocal (~1e-3-level error); everything else is exact f32.
    assert jnp.allclose(prefs, ref, atol=5e-3, rtol=5e-3), (prefs, ref)

    print("KERNEL_OK")
</pallas_src>

<mosaic_0001>
module attributes {stable_mosaic.version = 11 : i64} {
  func.func @_pref_kernel(%arg0: i32, %arg1: memref<32x512xf32, #tpu.memory_space<vmem>>, %arg2: memref<64x32xf32, #tpu.memory_space<vmem>>, %arg3: memref<64x1xf32, #tpu.memory_space<vmem>>, %arg4: memref<64x64xf32, #tpu.memory_space<vmem>>, %arg5: memref<64x1xf32, #tpu.memory_space<vmem>>, %arg6: memref<1x64xf32, #tpu.memory_space<vmem>>, %arg7: memref<1xf32, #tpu.memory_space<smem>>, %arg8: memref<1x1x512xf32, #tpu.memory_space<vmem>>) attributes {dimension_semantics = [#tpu.dimension_semantics<parallel>], iteration_bounds = array<i64: 2>, scalar_prefetch = 0 : i64, scratch_operands = 0 : i64, tpu.core_type = #tpu.core_type<tc>, window_params = [{transform_indices = @transform_0, window_bounds = array<i64: 32, 512>}, {pipeline_mode = #tpu.pipeline_mode<synchronous>, transform_indices = @transform_1, window_bounds = array<i64: 64, 32>}, {pipeline_mode = #tpu.pipeline_mode<synchronous>, transform_indices = @transform_2, window_bounds = array<i64: 64, 1>}, {pipeline_mode = #tpu.pipeline_mode<synchronous>, transform_indices = @transform_3, window_bounds = array<i64: 64, 64>}, {pipeline_mode = #tpu.pipeline_mode<synchronous>, transform_indices = @transform_4, window_bounds = array<i64: 64, 1>}, {pipeline_mode = #tpu.pipeline_mode<synchronous>, transform_indices = @transform_5, window_bounds = array<i64: 1, 64>}, {transform_indices = @transform_6, window_bounds = array<i64: 1>}, {transform_indices = @transform_7, window_bounds = array<i64: 1, 1, 512>}]} {
    %c0 = arith.constant 0 : index
    %c0_0 = arith.constant 0 : index
    %0 = vector.load %arg1[%c0, %c0_0] : memref<32x512xf32, #tpu.memory_space<vmem>>, vector<32x512xf32>
    %c0_1 = arith.constant 0 : index
    %c0_2 = arith.constant 0 : index
    %1 = vector.load %arg2[%c0_1, %c0_2] : memref<64x32xf32, #tpu.memory_space<vmem>>, vector<64x32xf32>
    %cst = arith.constant dense<0.000000e+00> : vector<64x512xf32>
    %2 = tpu.matmul %1, %0, %cst {dimension_numbers = #tpu.dot_dimension_numbers<[1], [0], [0], [1], [0, 0, 1, 1], [], []>} : vector<64x32xf32>, vector<32x512xf32>, vector<64x512xf32> -> vector<64x512xf32>
    %c0_3 = arith.constant 0 : index
    %c0_4 = arith.constant 0 : index
    %3 = vector.load %arg3[%c0_3, %c0_4] : memref<64x1xf32, #tpu.memory_space<vmem>>, vector<64x1xf32>
    %4 = vector.broadcast %3 : vector<64x1xf32> to vector<64x512xf32>
    %5 = arith.addf %2, %4 : vector<64x512xf32>
    %cst_5 = arith.constant 0.000000e+00 : f32
    %6 = vector.broadcast %cst_5 : f32 to vector<64x512xf32>
    %7 = arith.maximumf %5, %6 : vector<64x512xf32>
    %c0_6 = arith.constant 0 : index
    %c0_7 = arith.constant 0 : index
    %8 = vector.load %arg4[%c0_6, %c0_7] : memref<64x64xf32, #tpu.memory_space<vmem>>, vector<64x64xf32>
    %cst_8 = arith.constant dense<0.000000e+00> : vector<64x512xf32>
    %9 = tpu.matmul %8, %7, %cst_8 {dimension_numbers = #tpu.dot_dimension_numbers<[1], [0], [0], [1], [0, 0, 1, 1], [], []>} : vector<64x64xf32>, vector<64x512xf32>, vector<64x512xf32> -> vector<64x512xf32>
    %c0_9 = arith.constant 0 : index
    %c0_10 = arith.constant 0 : index
    %10 = vector.load %arg5[%c0_9, %c0_10] : memref<64x1xf32, #tpu.memory_space<vmem>>, vector<64x1xf32>
    %11 = vector.broadcast %10 : vector<64x1xf32> to vector<64x512xf32>
    %12 = arith.addf %9, %11 : vector<64x512xf32>
    %cst_11 = arith.constant 0.000000e+00 : f32
    %13 = vector.broadcast %cst_11 : f32 to vector<64x512xf32>
    %14 = arith.maximumf %12, %13 : vector<64x512xf32>
    %c0_12 = arith.constant 0 : index
    %c0_13 = arith.constant 0 : index
    %15 = vector.load %arg6[%c0_12, %c0_13] : memref<1x64xf32, #tpu.memory_space<vmem>>, vector<1x64xf32>
    %cst_14 = arith.constant dense<0.000000e+00> : vector<1x512xf32>
    %16 = tpu.matmul %15, %14, %cst_14 {dimension_numbers = #tpu.dot_dimension_numbers<[1], [0], [0], [1], [0, 0, 1, 1], [], []>} : vector<1x64xf32>, vector<64x512xf32>, vector<1x512xf32> -> vector<1x512xf32>
    %c0_15 = arith.constant 0 : index
    %17 = memref.load %arg7[%c0_15] : memref<1xf32, #tpu.memory_space<smem>>
    %18 = vector.broadcast %17 : f32 to vector<1x512xf32>
    %19 = arith.addf %16, %18 : vector<1x512xf32>
    %cst_16 = arith.constant 0.000000e+00 : f32
    %20 = vector.broadcast %cst_16 : f32 to vector<1x512xf32>
    %21 = arith.subf %20, %19 : vector<1x512xf32>
    %22 = math.exp %21 : vector<1x512xf32>
    %cst_17 = arith.constant 1.000000e+00 : f32
    %23 = vector.broadcast %cst_17 : f32 to vector<1x512xf32>
    %24 = arith.addf %23, %22 : vector<1x512xf32>
    %25 = tpu.reciprocal %24 {approx = true} : vector<1x512xf32> -> vector<1x512xf32>
    %c0_18 = arith.constant 0 : index
    %c0_19 = arith.constant 0 : index
    %c0_20 = arith.constant 0 : index
    %26 = vector.load %arg8[%c0_18, %c0_19, %c0_20] : memref<1x1x512xf32, #tpu.memory_space<vmem>>, vector<1x1x512xf32>
    %27 = vector.shape_cast %26 : vector<1x1x512xf32> to vector<1x512xf32>
    %28 = vector.shape_cast %25 : vector<1x512xf32> to vector<1x1x512xf32>
    tpu.vector_store %arg8[%c0_18, %c0_19, %c0_20], %28 {strides = array<i32>} : memref<1x1x512xf32, #tpu.memory_space<vmem>>, vector<1x1x512xf32>,
    return
  }
  func.func @transform_0(%arg0: i32) -> (i32, i32) {
    %c0_i32 = arith.constant 0 : i32
    %c0_i32_0 = arith.constant 0 : i32
    return %c0_i32, %arg0 : i32, i32
  }
  func.func @transform_1(%arg0: i32) -> (i32, i32) {
    %c0_i32 = arith.constant 0 : i32
    %c0_i32_0 = arith.constant 0 : i32
    %c0_i32_1 = arith.constant 0 : i32
    return %c0_i32, %c0_i32_0 : i32, i32
  }
  func.func @transform_2(%arg0: i32) -> (i32, i32) {
    %c0_i32 = arith.constant 0 : i32
    %c0_i32_0 = arith.constant 0 : i32
    %c0_i32_1 = arith.constant 0 : i32
    return %c0_i32, %c0_i32_0 : i32, i32
  }
  func.func @transform_3(%arg0: i32) -> (i32, i32) {
    %c0_i32 = arith.constant 0 : i32
    %c0_i32_0 = arith.constant 0 : i32
    %c0_i32_1 = arith.constant 0 : i32
    return %c0_i32, %c0_i32_0 : i32, i32
  }
  func.func @transform_4(%arg0: i32) -> (i32, i32) {
    %c0_i32 = arith.constant 0 : i32
    %c0_i32_0 = arith.constant 0 : i32
    %c0_i32_1 = arith.constant 0 : i32
    return %c0_i32, %c0_i32_0 : i32, i32
  }
  func.func @transform_5(%arg0: i32) -> (i32, i32) {
    %c0_i32 = arith.constant 0 : i32
    %c0_i32_0 = arith.constant 0 : i32
    %c0_i32_1 = arith.constant 0 : i32
    return %c0_i32, %c0_i32_0 : i32, i32
  }
  func.func @transform_6(%arg0: i32) -> i32 {
    %c0_i32 = arith.constant 0 : i32
    %c0_i32_0 = arith.constant 0 : i32
    return %c0_i32 : i32
  }
  func.func @transform_7(%arg0: i32) -> (i32, i32, i32) {
    %c0_i32 = arith.constant 0 : i32
    %c0_i32_0 = arith.constant 0 : i32
    %c0_i32_1 = arith.constant 0 : i32
    return %arg0, %c0_i32, %c0_i32_0 : i32, i32, i32
  }
}

</mosaic_0001>

<bundles_post_ra>
// kernel: tpu_custom_call.1
= control target key start
LH: loop header
LB: loop body
LE: loop exit
PB: predicated region body
PF: predicated region fallthrough
CT: control target
= control target key end

     0   :  { %s1945_s0 = inlined_call_operand.hbm [shape: f32[32,1024], index: 0, kind: input, shape index: {}]   ;;  %s1946_s1 = inlined_call_operand.vmem [shape: f32[64,32], index: 1, kind: input, shape index: {}]   ;;  %s1947_s2 = inlined_call_operand.vmem [shape: f32[64,1], index: 2, kind: input, shape index: {}]   ;;  %s1948_s3 = inlined_call_operand.vmem [shape: f32[64,64], index: 3, kind: input, shape index: {}]   ;;  %s1949_s4 = inlined_call_operand.vmem [shape: f32[64,1], index: 4, kind: input, shape index: {}]   ;;  %s1950_s5 = inlined_call_operand.vmem [shape: f32[1,64], index: 5, kind: input, shape index: {}]   ;;  %s1951_s6 = inlined_call_operand.<no memory space> [shape: f32[1], index: 6, kind: input, shape index: {}]   ;;  %s1952_s7 = inlined_call_operand.hbm [shape: f32[2,1,512], index: 7, kind: output, shape index: {}]  }
   0x1   :  { %12 = sst [smem:[#allocation2]] %s1951_s6 }
   0x2   :  { %13 = vsyncpa [#allocation4], 0 }
   0x3   :  { %15 = vsyncpa [#allocation4 + $0x1], 0 }
   0x4   :  { %16 = vsyncpa [#allocation5], 0 }
   0x5   :  { %18 = vsyncpa [#allocation5 + $0x1], 0  ;;  %s1545_s26 = smov 0   ;;  %s1547_s27 = smov 0  }
   0x6   :  { %s1549_s28 = smov 0   ;;  %s1551_s29 = smov 0  }
   0x7 LB: > { %s1566_s6 = sadd.s32 4294967295, %s1492_s29   ;;  %s1280_s30 = sadd.s32 4294967294, %s1492_s29   ;;  %s1492_s29 = sphi %s1551_s29, %s1968_s29   ;;  %s1488_s28 = sphi %s1549_s28, %s1967_s28   ;;  %s1484_s27 = sphi %s1547_s27, %s1966_s27   ;;  %s1480_s26 = sphi %s1545_s26, %s1965_s26  }
   0x8   : > { %s1570_s8 = sadd.s32 1, %s1492_s29   ;;  %s31_s9 = sadd.s32 1, %s1488_s28 }
   0x9   : > { %s28_s10 = ssub.s32 %s1492_s29, %s1570_s8  ;;  %p38_p0 = scmp.ne.s32.totalorder %s1488_s28, %s1484_s27 }
   0xa   : > { %p29_p1 = scmp.eq.s32.totalorder %s28_s10, 0  ;;  %p39_p2 = scmp.eq.s32.totalorder %s1492_s29, 0 }
   0xb   : > { %p44_p3 = scmp.ne.s32.totalorder %s1484_s27, %s1480_s26  ;;  %p45_p4 = scmp.eq.s32.totalorder %s1566_s6, 0 }
   0xc   : > { %s1582_s11 = scalar_select %p29_p1, %s1488_s28, %s31_s9  }
   0xd   : > { %p1584_p5 = por %p39_p2, %p38_p0  ;;  %p1588_p6 = por %p45_p4, %p44_p3 }
   0xe   : > { %p194_p7 = scmp.eq.s32.totalorder %s1566_s6, 1  ;;  %p200_p8 = scmp.eq.s32.totalorder %s1280_s30, 1 }
   0xf   : > { %s1956_s13 = scalar_select %p1588_p6, 1, 0 }
  0x10   : > { %p1342_p10 = scmp.lt.s32.totalorder %s1492_s29, 2  ;;  %p1595_p11 = por %p194_p7, %p38_p0 }
  0x11   : > { %p1599_p12 = por %p200_p8, %p44_p3  ;;  %s238_s16 = sand.u32 1, %s1488_s28  }
  0x12   : > { %s1957_s14 = scalar_select %p1595_p11, 1, 0 }
  0x13   : > { %s1958_s15 = scalar_select %p1599_p12, 1, 0 }
  0x14   : > { %s1328_s17 = sshll.u32 %s1492_s29, 9  ;;  %s1283_s18 = sshll.u32 %s238_s16, 7 }
  0x15   : > { %s1608_s21 = scalar_lea.hbm %s1945_s0, %s1328_s17  ;;  %s242_s22 = scalar_lea.vmem [#allocation3], %s1283_s18 }
  0x16   : > { %s249_s23 = sshll.u32 %s242_s22, 4  ;;  %p1612_p13 = pnand %p1342_p10, %p1584_p5  ;;  %s1616_s23 = int_to_ptr.vmem [resolvable:$true] %s249_s23 }
  0x17   : > { %s1619_s25 = scalar_lea.sflag [#allocation4], %s238_s16  ;;  %s1400_s30 = scalar_lea.hbm %s1608_s21, 2048 }
  0x18   : > { %p1401_p1 = scmp.ne.s32.totalorder %s1608_s21, %s1400_s30  ;;  %p1402_p2 = pneg %p1612_p13 }
  0x19   : > { %s1405_s12 = scalar_lea.hbm %s1945_s0, 4096  ;;  %p1406_p5 = scmp.lt.s32.totalorder %s1608_s21, %s1945_s0 }
  0x1a   : > { %p1403_p3 = pnand %p1402_p2, %p1401_p1  ;;  %p1407_p7 = scmp.lt.s32.totalorder %s1405_s12, %s1400_s30 }
  0x1c   : > { %p1404_p4 = pneg %p1403_p3  ;;  %p1408_p8 = por %p1407_p7, %p1406_p5 }
  0x1e   : > { %p1409_p10 = pnand %p1408_p8, %p1404_p4 }
  0x20   : > { %1412 = shalt.err (!%p1409_p10)
}
  0x21   : > { %s1413_s16 = scalar_lea.vmem %s1616_s23, 2048  ;;  %s1494_s19 = smov [#allocation3]  }
  0x22   : > { %p1414_p9 = scmp.ne.s32.totalorder %s1616_s23, %s1413_s16  ;;  %s1418_s20 = sshll.u32 %s1494_s19, 4  ;;  %s1419_s20 = int_to_ptr.vmem [resolvable:$false] %s1418_s20 }
  0x23   : > { %s1420_s22 = scalar_lea.vmem %s1419_s20, 4096  ;;  %p1421_p3 = scmp.lt.s32.totalorder %s1616_s23, %s1419_s20 }
  0x24   : > { %p1416_p0 = pnand %p1414_p9, %p1402_p2  ;;  %p1422_p12 = scmp.lt.s32.totalorder %s1420_s22, %s1413_s16 }
  0x26   : > { %p1417_p1 = pneg %p1416_p0  ;;  %p1423_p11 = por %p1422_p12, %p1421_p3 }
  0x28   : > { %p1424_p6 = pnand %p1423_p11, %p1417_p1 }
  0x2a   : > { %1427 = shalt.err (!%p1424_p6)
}
  0x2b   : > { %s1495_s30 = smov 1024   ;;  %s1496_s9 = smov 512  }
  0x2c   : > { %s1497_s10 = smov 32   ;;  %p257_p9 = scmp.lt.s32.totalorder %s1492_s29, 3 }
  0x2d   : > { %1337 = dma.hbm_to_vmem [thread:$0]  (!%p1612_p13), %s1608_s21, 2048, %s1616_s23, %s1619_s25, %s1495_s30, %s1496_s9, %s1497_s10  }
  0x2e   : > { %p1960_p0 = scmp.ge.s32.totalorder %s1492_s29, 1 }
  0x30   : > { %p258_p2 = pnand %p1960_p0, %p257_p9 }
  0x31   : > { %s1644_s12 = sand.u32 (!%p258_p2), 1, %s1484_s27   ;;  %p1961_p6 = scmp.ne.s32.totalorder (!%p258_p2), %s1956_s13, 0 }
  0x32   : > { %261 = sbr.rel (%p258_p2) target bundleno = 806 (0x326), region = 48  ;;  %s1287_s17 = sshll.u32 (!%p258_p2), %s1644_s12, 7 }
  0x33   : > { %s264_s18 = scalar_lea.sflag (!%p258_p2), [#allocation4], %s1644_s12  ;;  %s1648_s16 = scalar_lea.vmem (!%p258_p2), [#allocation3], %s1287_s17 }
  0x37   : > { %1471 = dma.done.wait (%p1961_p6), %s264_s18, 2048  }
  0x38   : > { %1473 = vsyncadd (%p1961_p6), %s264_s18, 4294965248  ;;  %v1498_v0 = vmov 0.0   ;;  %v1499_v1 = vmov 0   ;;  %v312_v2 = vld [vmem:[%s1648_s16 + $0x68] sm:$0xff]  ;;  %v314_v3 = vld [vmem:[%s1648_s16 + $0x78] sm:$0xff]  ;;  %vm371_vm0 = vcmask 261120  }
  0x39   : > { %460 = vmatprep.mubr.f32.mxu0 %v1498_v0  ;;  %573 = vmatprep.mubr.f32.mxu1 %v1498_v0  ;;  %v311_v4 = vld [vmem:[%s1648_s16 + $0x60] sm:$0xff]  ;;  %v313_v5 = vld [vmem:[%s1648_s16 + $0x70] sm:$0xff]  ;;  %v308_v6 = vld [vmem:[%s1648_s16 + $0x48] sm:$0xff]  ;;  %vm710_vm1 = vcmask 523264   ;;  %s994_s10 = sld [smem:[#allocation2]]  ;;  %s1288_s17 = sshll.u32 %s1644_s12, 2 }
  0x3a   : > { %1383 = vset.pattern.permute.xlu1 %v1499_v1  ;;  %1382 = vset.pattern.permute.xlu0 %v1499_v1  ;;  %v310_v7 = vld [vmem:[%s1648_s16 + $0x58] sm:$0xff]  ;;  %v307_v8 = vld [vmem:[%s1648_s16 + $0x40] sm:$0xff]  ;;  %v309_v9 = vld [vmem:[%s1648_s16 + $0x50] sm:$0xff]  ;;  %s1329_s18 = sshll.u32 %s1566_s6, 6  ;;  %s1196_s25 = scalar_lea.sflag [#allocation5], %s1644_s12 }
  0x3b   : > { %420 = vmatprep.subr.mxu0 %v312_v2  ;;  %533 = vmatprep.subr.mxu1 %v314_v3  ;;  %v304_v10 = vld [vmem:[%s1648_s16 + $0x28] sm:$0xff]  ;;  %v306_v11 = vld [vmem:[%s1648_s16 + $0x38] sm:$0xff]  ;;  %v303_v12 = vld [vmem:[%s1648_s16 + $0x20] sm:$0xff]  ;;  %s1208_s24 = scalar_lea.hbm %s1952_s7, %s1329_s18  ;;  %p1962_p12 = scmp.ne.s32.totalorder %s1957_s14, 0 }
  0x3c   : > { %421 = vmatpush1.msra.mxu0 %v311_v4  ;;  %534 = vmatpush1.msra.mxu1 %v313_v5  ;;  %v305_v13 = vld [vmem:[%s1648_s16 + $0x30] sm:$0xff]  ;;  %v300_v14 = vld [vmem:[%s1648_s16 + $0x8] sm:$0xff]  ;;  %v302_v15 = vld [vmem:[%s1648_s16 + $0x18] sm:$0xff]  ;;  %s1501_s20 = smov [#allocation6]  }
  0x3d   : > { %422 = vmatprep.subr.mxu0 %v308_v6  ;;  %535 = vmatprep.subr.mxu1 %v310_v7  ;;  %v299_v16 = vld [vmem:[%s1648_s16] sm:$0xff]  ;;  %v301_v17 = vld [vmem:[%s1648_s16 + $0x10] sm:$0xff]  ;;  %v328_v19 = vld [vmem:[%s1947_s2 + $0x28] sm:$0xff]  ;;  %s297_s16 = scalar_lea.vmem [#allocation6], %s1288_s17  ;;  %s1432_s22 = sshll.u32 %s1501_s20, 4  ;;  %s1433_s22 = int_to_ptr.vmem [resolvable:$false] %s1432_s22 }
  0x3e   : > { %423 = vmatpush1.msra.mxu0 %v307_v8  ;;  %536 = vmatpush1.msra.mxu1 %v309_v9  ;;  %v315_v18 = vld [vmem:[%s1946_s1] sm:$0xff]  ;;  %v330_v20 = vld [vmem:[%s1947_s2 + $0x38] sm:$0xff]  ;;  %v316_v21 = vld [vmem:[%s1946_s1 + $0x8] sm:$0xff]  ;;  %s1210_s13 = sshll.u32 %s297_s16, 4  ;;  %s1434_s6 = scalar_lea.vmem %s1433_s22, 128  ;;  %s1211_s13 = int_to_ptr.vmem [resolvable:$true] %s1210_s13 }
  0x3f   : > { %424 = vmatprep.subr.mxu0 %v304_v10  ;;  %537 = vmatprep.subr.mxu1 %v306_v11  ;;  %v327_v22 = vld [vmem:[%s1947_s2 + $0x20] sm:$0xff]  ;;  %v329_v23 = vld [vmem:[%s1947_s2 + $0x30] sm:$0xff]  ;;  %v326_v26 = vld [vmem:[%s1947_s2 + $0x18] sm:$0xff]  ;;  %s1428_s19 = scalar_lea.vmem %s1211_s13, 64  ;;  %p1435_p5 = scmp.lt.s32.totalorder %s1211_s13, %s1433_s22 }
  0x40   : > { %425 = vmatpush1.msra.mxu0 %v303_v12  ;;  %538 = vmatpush1.msra.mxu1 %v305_v13  ;;  %v317_v24 = vld [vmem:[%s1946_s1 + $0x10] sm:$0xff]  ;;  %v318_v27 = vld [vmem:[%s1946_s1 + $0x18] sm:$0xff]  ;;  %v323_v28 = vld [vmem:[%s1947_s2] sm:$0xff]  ;;  %p1429_p11 = scmp.ne.s32.totalorder %s1211_s13, %s1428_s19  ;;  %p1436_p7 = scmp.lt.s32.totalorder %s1434_s6, %s1428_s19 }
  0x41   : > { %426 = vmatprep.subr.mxu0 %v300_v14  ;;  %539 = vmatprep.subr.mxu1 %v302_v15  ;;  %v325_v25 = vld [vmem:[%s1947_s2 + $0x10] sm:$0xff]  ;;  %v324_v29 = vld [vmem:[%s1947_s2 + $0x8] sm:$0xff]  ;;  %v319_v30 = vld [vmem:[%s1946_s1 + $0x20] sm:$0xff] }
  0x42   : > { %427 = vmatpush1.msra.mxu0 %v299_v16  ;;  %540 = vmatpush1.msra.mxu1 %v301_v17  ;;  %v669_v31 = vld [vmem:[%s1949_s4 + $0x38] sm:$0xff]  ;;  %v668_v32 = vld [vmem:[%s1949_s4 + $0x30] sm:$0xff]  ;;  %v320_v33 = vld [vmem:[%s1946_s1 + $0x28] sm:$0xff]  ;;  %p1430_p13 = pnand %p1429_p11, %p1962_p12  ;;  %p1437_p8 = por %p1436_p7, %p1435_p5 }
  0x43   : > { %1289 = vmatmul.mubr.msk.f32.vlgmr.msra.gmra.mxu0 %vm371_vm0, %v315_v18  ;;  %1297 = vmatmul.mubr.msk.f32.vlgmr.msra.gmra.mxu1 %vm371_vm0, %v315_v18  ;;  %v667_v34 = vld [vmem:[%s1949_s4 + $0x28] sm:$0xff]  ;;  %v666_v35 = vld [vmem:[%s1949_s4 + $0x20] sm:$0xff]  ;;  %v321_v36 = vld [vmem:[%s1946_s1 + $0x30] sm:$0xff] }
  0x44   : > { %466 = vmatprep.mubr.f32.mxu0 %v1498_v0  ;;  %579 = vmatprep.mubr.f32.mxu1 %v1498_v0  ;;  %v665_v37 = vld [vmem:[%s1949_s4 + $0x18] sm:$0xff]  ;;  %v664_v38 = vld [vmem:[%s1949_s4 + $0x10] sm:$0xff]  ;;  %v663_v40 = vld [vmem:[%s1949_s4 + $0x8] sm:$0xff]  ;;  %p1431_p4 = pneg %p1430_p13 }
  0x45   : > { %358 = vperm.xlu1 %1383, %v328_v19   ;;  %368 = vperm.xlu0 %1382, %v330_v20   ;;  %v322_v39 = vld [vmem:[%s1946_s1 + $0x38] sm:$0xff]  ;;  %v662_v41 = vld [vmem:[%s1949_s4] sm:$0xff] }
  0x46   : > { %p1438_p10 = pnand %p1437_p8, %p1431_p4 }
  0x47   : > { %1290 = vmatmul.mubr.msk.f32.gmra.mxu0 %vm371_vm0, %v316_v21  ;;  %1298 = vmatmul.mubr.msk.f32.gmra.mxu1 %vm371_vm0, %v316_v21 }
  0x48   : > { %472 = vmatprep.mubr.f32.mxu0 %v1498_v0  ;;  %585 = vmatprep.mubr.f32.mxu1 %v1498_v0 }
  0x49   : > { %353 = vperm.xlu1 %1383, %v327_v22   ;;  %363 = vperm.xlu0 %1382, %v329_v23  }
  0x4b   : > { %1291 = vmatmul.mubr.msk.f32.gmra.mxu0 %vm371_vm0, %v317_v24  ;;  %1299 = vmatmul.mubr.msk.f32.gmra.mxu1 %vm371_vm0, %v317_v24 }
  0x4c   : > { %478 = vmatprep.mubr.f32.mxu0 %v1498_v0  ;;  %591 = vmatprep.mubr.f32.mxu1 %v1498_v0 }
  0x4d   : > { %343 = vperm.xlu1 %1383, %v325_v25   ;;  %348 = vperm.xlu0 %1382, %v326_v26  }
  0x4f   : > { %1292 = vmatmul.mubr.msk.f32.gmra.mxu0 %vm371_vm0, %v318_v27  ;;  %1300 = vmatmul.mubr.msk.f32.gmra.mxu1 %vm371_vm0, %v318_v27 }
  0x50   : > { %484 = vmatprep.mubr.f32.mxu0 %v1498_v0  ;;  %597 = vmatprep.mubr.f32.mxu1 %v1498_v0 }
  0x51   : > { %333 = vperm.xlu1 %1383, %v323_v28   ;;  %338 = vperm.xlu0 %1382, %v324_v29  }
  0x53   : > { %1293 = vmatmul.mubr.msk.f32.gmra.mxu0 %vm371_vm0, %v319_v30  ;;  %1301 = vmatmul.mubr.msk.f32.gmra.mxu1 %vm371_vm0, %v319_v30 }
  0x54   : > { %490 = vmatprep.mubr.f32.mxu0 %v1498_v0  ;;  %603 = vmatprep.mubr.f32.mxu1 %v1498_v0 }
  0x55   : > { %707 = vperm.xlu0 %1382, %v669_v31   ;;  %702 = vperm.xlu1 %1383, %v668_v32  }
  0x57   : > { %1294 = vmatmul.mubr.msk.f32.gmra.mxu0 %vm371_vm0, %v320_v33  ;;  %1302 = vmatmul.mubr.msk.f32.gmra.mxu1 %vm371_vm0, %v320_v33 }
  0x58   : > { %496 = vmatprep.mubr.f32.mxu0 %v1498_v0  ;;  %609 = vmatprep.mubr.f32.mxu1 %v1498_v0 }
  0x59   : > { %697 = vperm.xlu0 %1382, %v667_v34   ;;  %692 = vperm.xlu1 %1383, %v666_v35  }
  0x5b   : > { %1295 = vmatmul.mubr.msk.f32.gmra.mxu0 %vm371_vm0, %v321_v36  ;;  %1303 = vmatmul.mubr.msk.f32.gmra.mxu1 %vm371_vm0, %v321_v36 }
  0x5c   : > { %502 = vmatprep.mubr.f32.mxu0 %v1498_v0  ;;  %615 = vmatprep.mubr.f32.mxu1 %v1498_v0 }
  0x5d   : > { %687 = vperm.xlu0 %1382, %v665_v37   ;;  %682 = vperm.xlu1 %1383, %v664_v38  }
  0x5f   : > { %1296 = vmatmul.mubr.msk.f32.gmra.mxu0 %vm371_vm0, %v322_v39  ;;  %1304 = vmatmul.mubr.msk.f32.gmra.mxu1 %vm371_vm0, %v322_v39 }
  0x60   : > { %799 = vmatprep.mubr.f32.mxu0 %v1498_v0  ;;  %912 = vmatprep.mubr.f32.mxu1 %v1498_v0 }
  0x61   : > { %677 = vperm.xlu0 %1382, %v663_v40   ;;  %672 = vperm.xlu1 %1383, %v662_v41  }
  0xc0   : > { %v369_v1 = vpop.permute.xlu0 %368  ;;  %v359_v4 = vpop.permute.xlu1 %358 }
  0xc4   : > { %v364_v9 = vpop.permute.xlu0 %363  ;;  %v354_v12 = vpop.permute.xlu1 %353 }
  0xc8   : > { %v349_v23 = vpop.permute.xlu0 %348  ;;  %v344_v32 = vpop.permute.xlu1 %343 }
 0x103   : > { %v1776_v42 = vpop.f32.mrf.mxu0  ;;  %v1778_v43 = vpop.f32.mrf.mxu1 }
 0x105   : > { %v1780_v44 = vpop.f32.mrf.mxu0  ;;  %v1782_v45 = vpop.f32.mrf.mxu1 }
 0x107   : > { %v1784_v46 = vpop.f32.mrf.mxu0  ;;  %v1786_v47 = vpop.f32.mrf.mxu1 }
 0x109   : > { %v1788_v48 = vpop.f32.mrf.mxu0  ;;  %v1790_v49 = vpop.f32.mrf.mxu1 }
 0x10b   : > { %v1792_v50 = vpop.f32.mrf.mxu0  ;;  %v1794_v51 = vpop.f32.mrf.mxu1 }
 0x10d   : > { %v1796_v52 = vpop.f32.mrf.mxu0  ;;  %v1798_v53 = vpop.f32.mrf.mxu1 }
 0x10f   : > { %v480_v54 = vpop.f32.mrf.mxu0  ;;  %v593_v55 = vpop.f32.mrf.mxu1 }
 0x111   : > { %v482_v56 = vpop.f32.mrf.mxu0  ;;  %v595_v57 = vpop.f32.mrf.mxu1 }
 0x112   : > { %v483_v41 = vadd.f32 %v482_v56, %v349_v23  ;;  %v475_v56 = vadd.f32 %v1792_v50, %v344_v32 }
 0x113   : > { %v486_v58 = vpop.f32.mrf.mxu0  ;;  %v599_v59 = vpop.f32.mrf.mxu1 }
 0x114   : > { %v487_v37 = vadd.f32 %v486_v58, %v354_v12  ;;  %v600_v38 = vadd.f32 %v599_v59, %v354_v12  ;;  %v477_v58 = vadd.f32 %v1796_v52, %v344_v32  ;;  %v590_v59 = vadd.f32 %v1798_v53, %v344_v32 }
 0x115   : > { %v488_v60 = vpop.f32.mrf.mxu0  ;;  %v601_v61 = vpop.f32.mrf.mxu1  ;;  %v635_v52 = vmax.f32 %v483_v41, 0.0 }
 0x116   : > { %v489_v33 = vadd.f32 %v488_v60, %v354_v12  ;;  %v602_v34 = vadd.f32 %v601_v61, %v354_v12 }
 0x117   : > { %v492_v62 = vpop.f32.mrf.mxu0  ;;  %v605_v63 = vpop.f32.mrf.mxu1 }
 0x118   : > { %v493_v28 = vadd.f32 %v492_v62, %v359_v4  ;;  %v606_v29 = vadd.f32 %v605_v63, %v359_v4  ;;  %v481_v63 = vadd.f32 %v480_v54, %v349_v23  ;;  %v640_v54 = vmax.f32 %v600_v38, 0.0 }
 0x119   : > { %v494_v2 = vpop.f32.mrf.mxu0  ;;  %v607_v3 = vpop.f32.mrf.mxu1 }
 0x11a   : > { %v495_v24 = vadd.f32 %v494_v2, %v359_v4  ;;  %v608_v25 = vadd.f32 %v607_v3, %v359_v4  ;;  %v594_v3 = vadd.f32 %v593_v55, %v349_v23  ;;  %v642_v60 = vmax.f32 %v493_v28, 0.0  ;;  %v339_v4 = vpop.permute.xlu0 %338  ;;  %v334_v55 = vpop.permute.xlu1 %333 }
 0x11b   : > { %v498_v5 = vpop.f32.mrf.mxu0  ;;  %v611_v6 = vpop.f32.mrf.mxu1  ;;  %v644_v61 = vmax.f32 %v606_v29, 0.0  ;;  %v469_v53 = vadd.f32 %v1784_v46, %v339_v4  ;;  %v634_v50 = vmax.f32 %v481_v63, 0.0 }
 0x11c   : > { %v499_v21 = vadd.f32 %v498_v5, %v364_v9  ;;  %v612_v22 = vadd.f32 %v611_v6, %v364_v9  ;;  %v643_v2 = vmax.f32 %v495_v24, 0.0  ;;  %v645_v62 = vmax.f32 %v608_v25, 0.0  ;;  %v658_v24 = vld [vmem:[%s1948_s3 + $0x20] sm:$0xff]  ;;  %v659_v25 = vld [vmem:[%s1948_s3 + $0x28] sm:$0xff] }
 0x11d   : > { %v500_v7 = vpop.f32.mrf.mxu0  ;;  %v613_v8 = vpop.f32.mrf.mxu1  ;;  %v639_v5 = vmax.f32 %v489_v33, 0.0  ;;  %v641_v6 = vmax.f32 %v602_v34, 0.0  ;;  %v636_v12 = vmax.f32 %v594_v3, 0.0 }
 0x11e   : > { %v501_v17 = vadd.f32 %v500_v7, %v364_v9  ;;  %v614_v18 = vadd.f32 %v613_v8, %v364_v9  ;;  %v646_v39 = vmax.f32 %v499_v21, 0.0  ;;  %v648_v40 = vmax.f32 %v612_v22, 0.0  ;;  %v655_v21 = vld [vmem:[%s1948_s3 + $0x8] sm:$0xff]  ;;  %v656_v22 = vld [vmem:[%s1948_s3 + $0x10] sm:$0xff] }
 0x11f   : > { %v504_v10 = vpop.f32.mrf.mxu0  ;;  %v617_v11 = vpop.f32.mrf.mxu1  ;;  %v638_v7 = vmax.f32 %v487_v37, 0.0  ;;  %v471_v8 = vadd.f32 %v1788_v48, %v339_v4  ;;  %v584_v9 = vadd.f32 %v1790_v49, %v339_v4  ;;  %v633_v48 = vmax.f32 %v590_v59, 0.0 }
 0x120   : > { %v505_v13 = vadd.f32 %v504_v10, %v369_v1  ;;  %v618_v14 = vadd.f32 %v617_v11, %v369_v1  ;;  %v647_v35 = vmax.f32 %v501_v17, 0.0  ;;  %v649_v36 = vmax.f32 %v614_v18, 0.0 }
 0x121   : > { %v506_v15 = vpop.f32.mrf.mxu0  ;;  %v619_v16 = vpop.f32.mrf.mxu1  ;;  %v582_v11 = vadd.f32 %v1786_v47, %v339_v4  ;;  %v463_v49 = vadd.f32 %v1776_v42, %v334_v55  ;;  %v627_v47 = vmax.f32 %v471_v8, 0.0  ;;  %v629_v17 = vmax.f32 %v584_v9, 0.0 }
 0x122   : > { %v507_v19 = vadd.f32 %v506_v15, %v369_v1  ;;  %v620_v20 = vadd.f32 %v619_v16, %v369_v1  ;;  %v650_v30 = vmax.f32 %v505_v13, 0.0  ;;  %v652_v31 = vmax.f32 %v618_v14, 0.0  ;;  %v708_v4 = vpop.permute.xlu0 %707 }
 0x123   : > { %v596_v1 = vadd.f32 %v595_v57, %v349_v23  ;;  %v588_v57 = vadd.f32 %v1794_v51, %v344_v32  ;;  %v465_v51 = vadd.f32 %v1780_v44, %v334_v55  ;;  %v578_v13 = vadd.f32 %v1782_v45, %v334_v55  ;;  %v657_v23 = vld [vmem:[%s1948_s3 + $0x18] sm:$0xff] }
 0x124   : > { %v651_v26 = vmax.f32 %v507_v19, 0.0  ;;  %v653_v27 = vmax.f32 %v620_v20, 0.0  ;;  %v631_v14 = vmax.f32 %v477_v58, 0.0  ;;  %v576_v15 = vadd.f32 %v1778_v43, %v334_v55  ;;  %v654_v43 = vld [vmem:[%s1948_s3] sm:$0xff] }
 0x125   : > { %v637_v10 = vmax.f32 %v596_v1, 0.0  ;;  %v630_v16 = vmax.f32 %v475_v56, 0.0  ;;  %v632_v46 = vmax.f32 %v588_v57, 0.0  ;;  %v626_v18 = vmax.f32 %v469_v53, 0.0 }
 0x126   : > { %751 = vmatprep.subr.mxu0 %v651_v26  ;;  %864 = vmatprep.subr.mxu1 %v653_v27  ;;  %v628_v44 = vmax.f32 %v582_v11, 0.0  ;;  %v623_v45 = vmax.f32 %v465_v51, 0.0  ;;  %v625_v19 = vmax.f32 %v578_v13, 0.0  ;;  %v622_v20 = vmax.f32 %v463_v49, 0.0  ;;  %v660_v26 = vld [vmem:[%s1948_s3 + $0x30] sm:$0xff]  ;;  %v661_v27 = vld [vmem:[%s1948_s3 + $0x38] sm:$0xff] }
 0x127   : > { %752 = vmatpush1.msra.mxu0 %v650_v30  ;;  %865 = vmatpush1.msra.mxu1 %v652_v31  ;;  %v624_v42 = vmax.f32 %v576_v15, 0.0 }
 0x128   : > { %753 = vmatprep.subr.mxu0 %v647_v35  ;;  %866 = vmatprep.subr.mxu1 %v649_v36 }
 0x129   : > { %754 = vmatpush1.msra.mxu0 %v646_v39  ;;  %867 = vmatpush1.msra.mxu1 %v648_v40 }
 0x12a   : > { %755 = vmatprep.subr.mxu0 %v643_v2  ;;  %868 = vmatprep.subr.mxu1 %v645_v62 }
 0x12b   : > { %756 = vmatpush1.msra.mxu0 %v642_v60  ;;  %869 = vmatpush1.msra.mxu1 %v644_v61 }
 0x12c   : > { %757 = vmatprep.subr.mxu0 %v639_v5  ;;  %870 = vmatprep.subr.mxu1 %v641_v6  ;;  %v703_v5 = vpop.permute.xlu1 %702 }
 0x12d   : > { %758 = vmatpush1.msra.mxu0 %v638_v7  ;;  %871 = vmatpush1.msra.mxu1 %v640_v54  ;;  %v698_v54 = vpop.permute.xlu0 %697 }
 0x12e   : > { %759 = vmatprep.subr.mxu0 %v635_v52  ;;  %872 = vmatprep.subr.mxu1 %v637_v10 }
 0x12f   : > { %760 = vmatpush1.msra.mxu0 %v634_v50  ;;  %873 = vmatpush1.msra.mxu1 %v636_v12 }
 0x130   : > { %761 = vmatprep.subr.mxu0 %v631_v14  ;;  %874 = vmatprep.subr.mxu1 %v633_v48  ;;  %v693_v9 = vpop.permute.xlu1 %692 }
 0x131   : > { %762 = vmatpush1.msra.mxu0 %v630_v16  ;;  %875 = vmatpush1.msra.mxu1 %v632_v46 }
 0x132   : > { %763 = vmatprep.subr.mxu0 %v627_v47  ;;  %876 = vmatprep.subr.mxu1 %v629_v17  ;;  %v688_v47 = vpop.permute.xlu0 %687 }
 0x133   : > { %764 = vmatpush1.msra.mxu0 %v626_v18  ;;  %877 = vmatpush1.msra.mxu1 %v628_v44 }
 0x134   : > { %765 = vmatprep.subr.mxu0 %v623_v45  ;;  %878 = vmatprep.subr.mxu1 %v625_v19 }
 0x135   : > { %766 = vmatpush1.msra.mxu0 %v622_v20  ;;  %879 = vmatpush1.msra.mxu1 %v624_v42 }
 0x136   : > { %1305 = vmatmul.mubr.msk.f32.vlgmr.msra.gmra.mxu0 %vm710_vm1, %v654_v43  ;;  %1313 = vmatmul.mubr.msk.f32.vlgmr.msra.gmra.mxu1 %vm710_vm1, %v654_v43 }
 0x137   : > { %805 = vmatprep.mubr.f32.mxu0 %v1498_v0  ;;  %918 = vmatprep.mubr.f32.mxu1 %v1498_v0 }
 0x13a   : > { %1306 = vmatmul.mubr.msk.f32.gmra.mxu0 %vm710_vm1, %v655_v21  ;;  %1314 = vmatmul.mubr.msk.f32.gmra.mxu1 %vm710_vm1, %v655_v21  ;;  %v683_v21 = vpop.permute.xlu1 %682 }
 0x13b   : > { %811 = vmatprep.mubr.f32.mxu0 %v1498_v0  ;;  %924 = vmatprep.mubr.f32.mxu1 %v1498_v0 }
 0x13e   : > { %1307 = vmatmul.mubr.msk.f32.gmra.mxu0 %vm710_vm1, %v656_v22  ;;  %1315 = vmatmul.mubr.msk.f32.gmra.mxu1 %vm710_vm1, %v656_v22 }
 0x13f   : > { %817 = vmatprep.mubr.f32.mxu0 %v1498_v0  ;;  %930 = vmatprep.mubr.f32.mxu1 %v1498_v0 }
 0x142   : > { %1308 = vmatmul.mubr.msk.f32.gmra.mxu0 %vm710_vm1, %v657_v23  ;;  %1316 = vmatmul.mubr.msk.f32.gmra.mxu1 %vm710_vm1, %v657_v23 }
 0x143   : > { %823 = vmatprep.mubr.f32.mxu0 %v1498_v0  ;;  %936 = vmatprep.mubr.f32.mxu1 %v1498_v0 }
 0x146   : > { %1309 = vmatmul.mubr.msk.f32.gmra.mxu0 %vm710_vm1, %v658_v24  ;;  %1317 = vmatmul.mubr.msk.f32.gmra.mxu1 %vm710_vm1, %v658_v24 }
 0x147   : > { %829 = vmatprep.mubr.f32.mxu0 %v1498_v0  ;;  %942 = vmatprep.mubr.f32.mxu1 %v1498_v0 }
 0x14a   : > { %1310 = vmatmul.mubr.msk.f32.gmra.mxu0 %vm710_vm1, %v659_v25  ;;  %1318 = vmatmul.mubr.msk.f32.gmra.mxu1 %vm710_vm1, %v659_v25 }
 0x14b   : > { %835 = vmatprep.mubr.f32.mxu0 %v1498_v0  ;;  %948 = vmatprep.mubr.f32.mxu1 %v1498_v0 }
 0x14e   : > { %1311 = vmatmul.mubr.msk.f32.gmra.mxu0 %vm710_vm1, %v660_v26  ;;  %1319 = vmatmul.mubr.msk.f32.gmra.mxu1 %vm710_vm1, %v660_v26 }
 0x14f   : > { %841 = vmatprep.mubr.f32.mxu0 %v1498_v0  ;;  %954 = vmatprep.mubr.f32.mxu1 %v1498_v0 }
 0x152   : > { %1312 = vmatmul.mubr.msk.f32.gmra.mxu0 %vm710_vm1, %v661_v27  ;;  %1320 = vmatmul.mubr.msk.f32.gmra.mxu1 %vm710_vm1, %v661_v27 }
 0x153   : > { %1063 = vmatprep.mubr.f32.mxu0 %v1498_v0  ;;  %1134 = vmatprep.mubr.f32.mxu1 %v1498_v0 }
 0x1f6   : > { %v1868_v28 = vpop.f32.mrf.mxu0  ;;  %v1870_v29 = vpop.f32.mrf.mxu1 }
 0x1f8   : > { %v1872_v30 = vpop.f32.mrf.mxu0  ;;  %v1874_v31 = vpop.f32.mrf.mxu1 }
 0x1fa   : > { %v1876_v32 = vpop.f32.mrf.mxu0  ;;  %v1878_v33 = vpop.f32.mrf.mxu1 }
 0x1fc   : > { %v1880_v34 = vpop.f32.mrf.mxu0  ;;  %v1882_v35 = vpop.f32.mrf.mxu1 }
 0x1fe   : > { %v1884_v36 = vpop.f32.mrf.mxu0  ;;  %v1886_v37 = vpop.f32.mrf.mxu1 }
 0x200   : > { %v1888_v0 = vpop.f32.mrf.mxu0  ;;  %v1890_v38 = vpop.f32.mrf.mxu1 }
 0x202   : > { %v819_v39 = vpop.f32.mrf.mxu0  ;;  %v932_v40 = vpop.f32.mrf.mxu1 }
 0x204   : > { %v821_v41 = vpop.f32.mrf.mxu0  ;;  %v934_v1 = vpop.f32.mrf.mxu1 }
 0x205   : > { %v822_v26 = vadd.f32 %v821_v41, %v688_v47  ;;  %v935_v27 = vadd.f32 %v934_v1, %v688_v47  ;;  %v678_v41 = vpop.permute.xlu0 %677  ;;  %v814_v1 = vadd.f32 %v1884_v36, %v683_v21 }
 0x206   : > { %v825_v2 = vpop.f32.mrf.mxu0  ;;  %v938_v62 = vpop.f32.mrf.mxu1 }
 0x207   : > { %v826_v22 = vadd.f32 %v825_v2, %v693_v9  ;;  %v939_v23 = vadd.f32 %v938_v62, %v693_v9  ;;  %v929_v2 = vadd.f32 %v1890_v38, %v683_v21  ;;  %v673_v38 = vpop.permute.xlu1 %672 }
 0x208   : > { %v827_v63 = vpop.f32.mrf.mxu0  ;;  %v940_v3 = vpop.f32.mrf.mxu1 }
 0x209   : > { %v828_v19 = vadd.f32 %v827_v63, %v693_v9  ;;  %v941_v20 = vadd.f32 %v940_v3, %v693_v9  ;;  %v933_v63 = vadd.f32 %v932_v40, %v688_v47  ;;  %v810_v40 = vadd.f32 %v1880_v34, %v678_v41 }
 0x20a   : > { %v831_v60 = vpop.f32.mrf.mxu0  ;;  %v944_v61 = vpop.f32.mrf.mxu1  ;;  %v917_v9 = vadd.f32 %v1874_v31, %v673_v38 }
 0x20b   : > { %v832_v17 = vadd.f32 %v831_v60, %v698_v54  ;;  %v945_v18 = vadd.f32 %v944_v61, %v698_v54  ;;  %v820_v61 = vadd.f32 %v819_v39, %v688_v47  ;;  %v978_v62 = vmax.f32 %v828_v19, 0.0 }
 0x20c   : > { %v833_v58 = vpop.f32.mrf.mxu0  ;;  %v946_v59 = vpop.f32.mrf.mxu1  ;;  %v979_v39 = vmax.f32 %v939_v23, 0.0 }
 0x20d   : > { %v834_v49 = vadd.f32 %v833_v58, %v698_v54  ;;  %v947_v15 = vadd.f32 %v946_v59, %v698_v54  ;;  %v981_v3 = vmax.f32 %v832_v17, 0.0  ;;  %v983_v58 = vmax.f32 %v945_v18, 0.0 }
 0x20e   : > { %v837_v6 = vpop.f32.mrf.mxu0  ;;  %v950_v56 = vpop.f32.mrf.mxu1  ;;  %v816_v59 = vadd.f32 %v1888_v0, %v683_v21  ;;  %v974_v0 = vmax.f32 %v822_v26, 0.0  ;;  %v808_v54 = vadd.f32 %v1876_v32, %v678_v41  ;;  %v973_v36 = vmax.f32 %v820_v61, 0.0 }
 0x20f   : > { %v838_v14 = vadd.f32 %v837_v6, %v703_v5  ;;  %v951_v48 = vadd.f32 %v950_v56, %v703_v5  ;;  %v984_v60 = vmax.f32 %v947_v15, 0.0  ;;  %v927_v6 = vadd.f32 %v1886_v37, %v683_v21 }
 0x210   : > { %v839_v57 = vpop.f32.mrf.mxu0  ;;  %v952_v7 = vpop.f32.mrf.mxu1  ;;  %v977_v56 = vmax.f32 %v826_v22, 0.0  ;;  %v804_v37 = vadd.f32 %v1872_v30, %v673_v38  ;;  %v970_v34 = vmax.f32 %v816_v59, 0.0  ;;  %v1500_v61 = vmov 1966171168  }
 0x211   : > { %v840_v50 = vadd.f32 %v839_v57, %v703_v5  ;;  %v953_v12 = vadd.f32 %v952_v7, %v703_v5  ;;  %v985_v24 = vmax.f32 %v838_v14, 0.0  ;;  %v987_v25 = vmax.f32 %v951_v48, 0.0 }
 0x212   : > { %v843_v55 = vpop.f32.mrf.mxu0  ;;  %v956_v8 = vpop.f32.mrf.mxu1  ;;  %v980_v5 = vmax.f32 %v941_v20, 0.0  ;;  %v923_v57 = vadd.f32 %v1882_v35, %v678_v41  ;;  %v976_v7 = vmax.f32 %v935_v27, 0.0  ;;  %v802_v35 = vadd.f32 %v1868_v28, %v673_v38 }
 0x213   : > { %v844_v52 = vadd.f32 %v843_v55, %v708_v4  ;;  %v957_v10 = vadd.f32 %v956_v8, %v708_v4  ;;  %v986_v42 = vmax.f32 %v840_v50, 0.0  ;;  %v988_v43 = vmax.f32 %v953_v12, 0.0 }
 0x214   : > { %v845_v53 = vpop.f32.mrf.mxu0  ;;  %v958_v11 = vpop.f32.mrf.mxu1  ;;  %v921_v55 = vadd.f32 %v1878_v33, %v678_v41  ;;  %v975_v8 = vmax.f32 %v933_v63, 0.0  ;;  %v971_v32 = vmax.f32 %v927_v6, 0.0  ;;  %v966_v33 = vmax.f32 %v810_v40, 0.0 }
 0x215   : > { %v846_v51 = vadd.f32 %v845_v53, %v708_v4  ;;  %v959_v13 = vadd.f32 %v958_v11, %v708_v4  ;;  %v989_v44 = vmax.f32 %v844_v52, 0.0  ;;  %v991_v45 = vmax.f32 %v957_v10, 0.0 }
 0x216   : > { %v982_v4 = vmax.f32 %v834_v49, 0.0  ;;  %v972_v52 = vmax.f32 %v929_v2, 0.0  ;;  %v915_v10 = vadd.f32 %v1870_v29, %v673_v38  ;;  %v969_v53 = vmax.f32 %v814_v1, 0.0  ;;  %v993_v29 = vld [vmem:[%s1950_s5] sm:$0x1] }
 0x217   : > { %v990_v16 = vmax.f32 %v846_v51, 0.0  ;;  %v992_v46 = vmax.f32 %v959_v13, 0.0  ;;  %v968_v11 = vmax.f32 %v923_v57, 0.0  ;;  %v965_v50 = vmax.f32 %v808_v54, 0.0 }
 0x218   : > { %v967_v30 = vmax.f32 %v921_v55, 0.0  ;;  %v962_v31 = vmax.f32 %v804_v37, 0.0  ;;  %v964_v12 = vmax.f32 %v917_v9, 0.0  ;;  %v961_v51 = vmax.f32 %v802_v35, 0.0 }
 0x219   : > { %1015 = vmatprep.subr.mxu0 %v990_v16  ;;  %1086 = vmatprep.subr.mxu1 %v992_v46  ;;  %v963_v28 = vmax.f32 %v915_v10, 0.0  ;;  %v995_v13 = vstv %s994_s10  ;;  %v1168_v63 = vunpack.c.l.s4 %v1500_v61 }
 0x21a   : > { %1016 = vmatpush1.msra.mxu0 %v989_v44  ;;  %1087 = vmatpush1.msra.mxu1 %v991_v45 }
 0x21b   : > { %1017 = vmatprep.subr.mxu0 %v986_v42  ;;  %1088 = vmatprep.subr.mxu1 %v988_v43 }
 0x21c   : > { %1018 = vmatpush1.msra.mxu0 %v985_v24  ;;  %1089 = vmatpush1.msra.mxu1 %v987_v25 }
 0x21d   : > { %1019 = vmatprep.subr.mxu0 %v982_v4  ;;  %1090 = vmatprep.subr.mxu1 %v984_v60 }
 0x21e   : > { %1020 = vmatpush1.msra.mxu0 %v981_v3  ;;  %1091 = vmatpush1.msra.mxu1 %v983_v58  ;;  %v1170_v3 = vlaneseq  ;;  %v1169_v58 = vunpack.c.0.s8 %v1168_v63 }
 0x21f   : > { %1021 = vmatprep.subr.mxu0 %v978_v62  ;;  %1092 = vmatprep.subr.mxu1 %v980_v5 }
 0x220   : > { %1022 = vmatpush1.msra.mxu0 %v977_v56  ;;  %1093 = vmatpush1.msra.mxu1 %v979_v39  ;;  %v1171_v59 = vshrl.u32 %v1170_v3, 7  ;;  %vm1192_vm2 = vcmp.lt.s32.totalorder %v1170_v3, 512 }
 0x221   : > { %1023 = vmatprep.subr.mxu0 %v974_v0  ;;  %1094 = vmatprep.subr.mxu1 %v976_v7 }
 0x222   : > { %1024 = vmatpush1.msra.mxu0 %v973_v36  ;;  %1095 = vmatpush1.msra.mxu1 %v975_v8  ;;  %v1172_v5 = vsub.s32 %v1169_v58, %v1171_v59 }
 0x223   : > { %1025 = vmatprep.subr.mxu0 %v970_v34  ;;  %1096 = vmatprep.subr.mxu1 %v972_v52 }
 0x224   : > { %1026 = vmatpush1.msra.mxu0 %v969_v53  ;;  %1097 = vmatpush1.msra.mxu1 %v971_v32 }
 0x225   : > { %1027 = vmatprep.subr.mxu0 %v966_v33  ;;  %1098 = vmatprep.subr.mxu1 %v968_v11 }
 0x226   : > { %1028 = vmatpush1.msra.mxu0 %v965_v50  ;;  %1099 = vmatpush1.msra.mxu1 %v967_v30 }
 0x227   : > { %1029 = vmatprep.subr.mxu0 %v962_v31  ;;  %1100 = vmatprep.subr.mxu1 %v964_v12 }
 0x228   : > { %1030 = vmatpush1.msra.mxu0 %v961_v51  ;;  %1101 = vmatpush1.msra.mxu1 %v963_v28 }
 0x229   : > { %1321 = vmatmul.mubr.msk.f32.vlgmr.msra.gmra.mxu0 %vm710_vm1, %v993_v29  ;;  %1322 = vmatmul.mubr.msk.f32.vlgmr.msra.gmra.mxu1 %vm710_vm1, %v993_v29 }
 0x2e9   : > { %v1065_v14 = vpop.f32.mrf.mxu0  ;;  %v1136_v48 = vpop.f32.mrf.mxu1 }
 0x2ea   : > { %v1066_v49 = vadd.f32 %v1065_v14, %v995_v13  ;;  %v1137_v15 = vadd.f32 %v1136_v48, %v995_v13 }
 0x2eb   : > { %v1067_v16 = vpop.f32.mrf.mxu0  ;;  %v1138_v46 = vpop.f32.mrf.mxu1 }
 0x2ec   : > { %v1141_v47 = vsub.f32 0.0, %v1066_v49  ;;  %v1143_v17 = vsub.f32 0.0, %v1137_v15  ;;  %v1068_v18 = vadd.f32 %v1067_v16, %v995_v13  ;;  %v1139_v44 = vadd.f32 %v1138_v46, %v995_v13 }
 0x2ee   : > { %v1145_v45 = vmul.f32 1.442695, %v1141_v47  ;;  %v1149_v19 = vmul.f32 1.442695, %v1143_v17  ;;  %v1142_v20 = vsub.f32 0.0, %v1068_v18  ;;  %v1144_v42 = vsub.f32 0.0, %v1139_v44 }
 0x2f0   : > { %1384 = vpow2.f32 %v1145_v45  ;;  %v1147_v43 = vmul.f32 1.442695, %v1142_v20  ;;  %v1151_v21 = vmul.f32 1.442695, %v1144_v42 }
 0x2f1   : > { %1386 = vpow2.f32 %v1149_v19 }
 0x2f2   : > { %1388 = vpow2.f32 %v1147_v43 }
 0x2f3   : > { %1390 = vpow2.f32 %v1151_v21 }
 0x2fd   : > { %v1385_v22 = vpop.eup %1384 }
 0x2fe   : > { %v1387_v23 = vpop.eup %1386  ;;  %v1153_v24 = vadd.f32 1.0, %v1385_v22 }
 0x2ff   : > { %v1389_v25 = vpop.eup %1388  ;;  %v1155_v26 = vadd.f32 1.0, %v1387_v23 }
 0x300   : > { %v1391_v27 = vpop.eup %1390  ;;  %1392 = vrcp.f32 %v1153_v24  ;;  %v1154_v4 = vadd.f32 1.0, %v1389_v25 }
 0x301   : > { %1394 = vrcp.f32 %v1155_v26  ;;  %v1156_v60 = vadd.f32 1.0, %v1391_v27 }
 0x302   : > { %1396 = vrcp.f32 %v1154_v4 }
 0x303   : > { %1398 = vrcp.f32 %v1156_v60 }
 0x30d   : > { %v1393_v2 = vpop.eup %1392 }
 0x30e   : > { %v1395_v62 = vpop.eup %1394 }
 0x30f   : > { %v1397_v41 = vpop.eup %1396 }
 0x310   : > { %v1399_v1 = vpop.eup %1398  ;;  %v1165_v6 = vcombine.low %v1393_v2, %v1397_v41 }
 0x311   : > { %v1166_v56 = vcombine.low %v1395_v62, %v1399_v1 }
 0x312   : > { %v1173_v39 = vrot.slane %v1165_v6, %v1172_v5 }
 0x313   : > { %v1180_v40 = vrot.slane %v1166_v56, %v1172_v5 }
 0x315   : > { %v1181_v57 = vcombine.low %v1173_v39, %v1180_v40 }
 0x317   : > { %v1188_v0 = vrot.slane %v1181_v57, %v1172_v5 }
 0x319   : > { %1194 = vst.msk [vmem:[%s297_s16] sm:$0xf] %vm1192_vm2, %v1188_v0 }
 0x31a   : > { %1441 = shalt.err (!%p1438_p10)
}
 0x31b   : > { %s1442_s30 = scalar_lea.hbm %s1208_s24, 64  ;;  %s1446_s10 = scalar_lea.hbm %s1952_s7, 128 }
 0x31c   : > { %p1443_p1 = scmp.ne.s32.totalorder %s1208_s24, %s1442_s30  ;;  %p1447_p0 = scmp.lt.s32.totalorder %s1208_s24, %s1952_s7 }
 0x31d   : > { %p1448_p2 = scmp.lt.s32.totalorder %s1446_s10, %s1442_s30 }
 0x31e   : > { %p1444_p3 = pnand %p1443_p1, %p1962_p12 }
 0x31f   : > { %p1449_p6 = por %p1448_p2, %p1447_p0 }
 0x320   : > { %p1445_p9 = pneg %p1444_p3 }
 0x322   : > { %p1450_p11 = pnand %p1449_p6, %p1445_p9 }
 0x324   : > { %1453 = shalt.err (!%p1450_p11)
}
 0x325   : > { %1332 = dma.vmem_to_hbm [thread:$0]  (%p1962_p12), %s1211_s13, 64, %s1208_s24, %s1196_s25  }
 0x326 PF: > { %s1222_s16 = sand.u32 1, %s1480_s26   ;;  %p1963_p13 = scmp.ne.s32.totalorder %s1958_s15, 0 }
 0x327   : > { %p1964_p4 = scmp.ge.s32.totalorder %s1492_s29, 2  ;;  %s1223_s21 = scalar_lea.sflag [#allocation5], %s1222_s16 }
 0x329   : > { %p1339_p5 = pnand %p1964_p4, %p1963_p13 }
 0x32b   : > { %p1340_p7 = pneg %p1339_p5 }
 0x32d   : > { %1475 = dma.done.wait (%p1340_p7), %s1223_s21, 64  }
 0x32e   : > { %1477 = vsyncadd (%p1340_p7), %s1223_s21, 4294967232  ;;  %p21_p8 = scmp.ge.s32.totalorder %s1570_s8, 4   ;;  %s1965_s26 = smov %s1484_s27 }
 0x32f   : > { %s1966_s27 = smov %s1488_s28  ;;  %s1967_s28 = smov %s1582_s11 }
 0x330   : > { %s1968_s29 = smov %s1570_s8  ;;  %23 = sbr.rel (!%p21_p8) target bundleno = 7 (0x7), region = 93 }
 0x335   :  { %1228 = vsyncpa [#allocation4], 1 }
 0x336   :  { %1230 = vsyncpa [#allocation4 + $0x1], 1 }
 0x337   :  { %1231 = vsyncpa [#allocation5], 1 }
 0x338   :  { %1233 = vsyncpa [#allocation5 + $0x1], 1 }

</bundles_post_ra>
